<compile_context>
chip_gen: v7x
topology: tpu7x:2x2x1
jax: 0.10.0
libtpu: 0.0.40
codegen_flags: <defaults>
</compile_context>

<pallas_src>
import math
from functools import partial
from typing import Sequence

import jax
import jax.numpy as jnp
from jax import lax
from jax.experimental import pallas as pl
from jax.experimental.pallas import tpu as pltpu


def _round_up(x: int, m: int) -> int:
    return (x + m - 1) // m * m


def _cdiv(a: int, b: int) -> int:
    return -(-a // b)


# ----------------------------- Pallas kernel ---------------------------------
def _pos_enc_kernel(*refs, outer_dims, CH):
    # refs = (bias_ref, wrow_ref[, wout_ref], o_ref)
    #   bias_ref : (1, TL)   fused bias + inner-dim contribution + '-1' offsets
    #   wrow_ref : (1, TL)   prescaled (step * W) weight row for the sublane dim
    #   wout_ref : (n_outer_dims, TL) prescaled weight rows for outer dims
    #   o_ref    : (TR, TL)  output tile
    if outer_dims:
        bias_ref, wrow_ref, wout_ref, o_ref = refs
    else:
        bias_ref, wrow_ref, o_ref = refs
        wout_ref = None
    TR, TL = o_ref.shape

    base = bias_ref[...]                                   # (1, TL)

    # Outer-dim coordinates: scalar div/mod on the scalar unit, once per tile,
    # then one (1, TL) FMA per outer dim (negligible vs. the tile body).
    if outer_dims:
        rem = pl.program_id(0)
        for k in range(len(outer_dims) - 1, -1, -1):
            if k > 0:
                idx = rem % outer_dims[k]
                rem = rem // outer_dims[k]
            else:
                idx = rem
            base = base + idx.astype(jnp.float32) * wout_ref[k:k + 1, :]

    wrow = wrow_ref[...]                                   # (1, TL)
    row0 = pl.program_id(1) * TR
    # Sublane iota is constant across chunks -> hoisted out of the loop.
    iota_f = lax.broadcasted_iota(jnp.int32, (CH, TL), 0).astype(jnp.float32)
    n_chunks = TR // CH

    def emit(row_start, off):
        r_f = row_start.astype(jnp.float32) + iota_f       # (CH, TL)
        o_ref[pl.ds(off, CH), :] = (r_f * wrow + base).astype(o_ref.dtype)

    if n_chunks == 1:
        emit(row0, 0)
    else:
        def body(i, carry):
            off = pl.multiple_of(i * CH, CH)               # aligned sublane store
            emit(row0 + i * CH, off)
            return carry
        lax.fori_loop(0, n_chunks, body, 0, unroll=min(4, n_chunks))


# ------------------------------- wrapper --------------------------------------
def relative_factorized_position_pallas(dims: Sequence[int],
                                        w1, b1, w2, b2,
                                        *, out_dtype=jnp.float32,
                                        lane_tile: int = 2048,
                                        target_tile_bytes: int = 1 << 20):
    """Pallas implementation of relative_factorized_position.

    NOTE: weights are expected pre-transposed to (in, out) layout:
      w1: (d_in, H), b1: (H,), w2: (H, H), b2: (H,).
    The fc1/fc2 algebraic fusion is valid because this module has no
    activation/normalization between the two Linears.
    Returns (1, L, H) array of `out_dtype`, L = prod(dims).
    """
    dims = tuple(int(d) for d in dims)
    d_in = len(dims)
    assert d_in >= 1
    assert w1.shape[0] == d_in and w1.shape[1] == w2.shape[0], \
        "weights must be passed transposed, layout (in, out)"
    H = int(w2.shape[1])
    L = math.prod(dims)
    f32 = jnp.float32

    # ---- algebraic fusion of fc1 / fc2 (exact up to fp32 reassociation) -----
    w1f = w1.astype(f32)
    w2f = w2.astype(f32)
    W = w1f @ w2f                                               # (d_in, H)
    b1v = b1.astype(f32) if b1 is not None else jnp.zeros((w1.shape[1],), f32)
    b2v = b2.astype(f32) if b2 is not None else jnp.zeros((H,), f32)
    b = b1v @ w2f + b2v                                         # (H,)

    steps = [2.0 / (d - 1) if d > 1 else 0.0 for d in dims]
    D_last = dims[-1]
    D_row = dims[-2] if d_in >= 2 else 1
    outer_dims = dims[:-2] if d_in >= 3 else ()
    n_outer = math.prod(outer_dims) if outer_dims else 1

    # ---- per-lane constants over the packed lane axis (lane = i_last*H + h) --
    coords_last = jnp.linspace(-1.0, 1.0, D_last, dtype=f32)
    lanes_full = D_last * H
    # inner-dim contribution is fully lane-determined -> fold into the bias
    bias_lane = (jnp.tile(b, (D_last,))
                 + (coords_last[:, None] * W[d_in - 1][None, :]).reshape(-1))
    if d_in >= 2:
        # coord = idx*step - 1  ->  prescale weight, fold the '-1' into the bias
        bias_lane = bias_lane - jnp.tile(W[d_in - 2], (D_last,))
        wrow_lane = jnp.tile(steps[d_in - 2] * W[d_in - 2], (D_last,))
    else:
        wrow_lane = jnp.zeros((lanes_full,), f32)
    for k in range(len(outer_dims)):
        bias_lane = bias_lane - jnp.tile(W[k], (D_last,))
    wout_lanes = None
    if outer_dims:
        wout_lanes = jnp.stack(
            [jnp.tile(steps[k] * W[k], (D_last,)) for k in range(len(outer_dims))])

    # ---- lane tiling: multiple of 128 (unmasked, wide stores) ----------------
    TL = _round_up(min(int(lane_tile), _round_up(lanes_full, 128)), 128)
    n_lane_tiles = _cdiv(lanes_full, TL)
    W_pad = n_lane_tiles * TL
    pad = W_pad - lanes_full
    if pad:
        bias_lane = jnp.pad(bias_lane, (0, pad))
        wrow_lane = jnp.pad(wrow_lane, (0, pad))
        if wout_lanes is not None:
            wout_lanes = jnp.pad(wout_lanes, ((0, 0), (0, pad)))
    bias_lane = bias_lane.reshape(1, W_pad)
    wrow_lane = wrow_lane.reshape(1, W_pad)

    # ---- row tiling (sublane multiple of 8, ~1 MiB output blocks) ------------
    out_isize = jnp.dtype(out_dtype).itemsize
    R_need = _round_up(D_row, 8)
    rows_cap = max(8, (int(target_tile_bytes) // (TL * out_isize)) // 8 * 8)
    TR = min(R_need, rows_cap)
    n_row_tiles = _cdiv(D_row, TR)
    # v7x has 2 TensorCores: avoid a single-tile launch when splittable.
    if n_outer * n_row_tiles * n_lane_tiles == 1 and TR >= 16:
        TR = _round_up(_cdiv(D_row, 2), 8)
        n_row_tiles = _cdiv(D_row, TR)
    R_pad = n_row_tiles * TR
    CH = 8  # sublane chunk per inner-loop step (keeps the elementwise chain in vregs)

    grid = (n_outer, n_row_tiles, n_lane_tiles)
    in_specs = [pl.BlockSpec((1, TL), lambda o, r, c: (0, c)),
                pl.BlockSpec((1, TL), lambda o, r, c: (0, c))]
    inputs = [bias_lane, wrow_lane]
    if wout_lanes is not None:
        in_specs.append(pl.BlockSpec((len(outer_dims), TL), lambda o, r, c: (0, c)))
        inputs.append(wout_lanes)
    out_specs = pl.BlockSpec((TR, TL), lambda o, r, c: (o * n_row_tiles + r, c))

    kernel = partial(_pos_enc_kernel, outer_dims=outer_dims, CH=CH)

    out_bytes = n_outer * R_pad * W_pad * out_isize
    in_bytes = (2 + len(outer_dims)) * W_pad * 4

    out_packed = pl.pallas_call(
        kernel,
        out_shape=jax.ShapeDtypeStruct((n_outer * R_pad, W_pad), out_dtype),
        grid_spec=pltpu.PrefetchScalarGridSpec(
            num_scalar_prefetch=0, grid=grid,
            in_specs=in_specs, out_specs=out_specs),
        compiler_params=pltpu.CompilerParams(
            dimension_semantics=("parallel", "parallel", "parallel")),
        cost_estimate=pl.CostEstimate(
            flops=3 * n_outer * R_pad * W_pad,
            transcendentals=0,
            bytes_accessed=out_bytes + in_bytes),
    )(*inputs)

    # Contiguous unpack: drop padded rows/lanes, reshape to (1, L, H).
    out = out_packed.reshape(n_outer, R_pad, W_pad)[:, :D_row, :lanes_full]
    return out.reshape(1, L, H)


# ----------------------- deterministic parameter init -------------------------
def init_params(key, d_in: int, hidden: int):
    """Mimic the module __init__: trunc_normal(std=0.02) weights,
    uniform(-1/sqrt(fan_in), 1/sqrt(fan_in)) biases. Stored transposed (in, out)."""
    k1, k2, k3, k4 = jax.random.split(key, 4)
    w1 = 0.02 * jax.random.truncated_normal(k1, -2.0, 2.0, (d_in, hidden), jnp.float32)
    w2 = 0.02 * jax.random.truncated_normal(k2, -2.0, 2.0, (hidden, hidden), jnp.float32)
    b1 = jax.random.uniform(k3, (hidden,), jnp.float32,
                            -1.0 / math.sqrt(d_in), 1.0 / math.sqrt(d_in))
    b2 = jax.random.uniform(k4, (hidden,), jnp.float32,
                            -1.0 / math.sqrt(hidden), 1.0 / math.sqrt(hidden))
    return w1, b1, w2, b2


# ------------------------------ reference (JAX) --------------------------------
def reference(dims, w1, b1, w2, b2):
    lens = [jnp.linspace(-1.0, 1.0, d, dtype=jnp.float32) for d in dims]
    grid = jnp.stack(jnp.meshgrid(*lens, indexing="ij"), axis=-1).reshape(1, -1, len(dims))
    y = grid @ w1 + b1
    return y @ w2 + b2


if __name__ == "__main__":
    hidden = 32

    # 2-D positions (typical ViT case): aligned, non-divisible (padded tails),
    # and a larger case that exercises the multi-chunk fori_loop path.
    w1, b1, w2, b2 = init_params(jax.random.PRNGKey(0), 2, hidden)
    for dims in [(16, 16), (15, 17), (64, 48)]:
        out = jax.block_until_ready(
            relative_factorized_position_pallas(dims, w1, b1, w2, b2))
        ref = reference(dims, w1, b1, w2, b2)
        L = math.prod(dims)
        assert out.shape == (1, L, hidden), out.shape
        assert jnp.allclose(out, ref, atol=3e-5, rtol=1e-5), f"mismatch dims={dims}"

    # 3-D positions: exercises the scalar (program_id) outer-dim path.
    w1, b1, w2, b2 = init_params(jax.random.PRNGKey(1), 3, hidden)
    dims = (4, 6, 10)
    out = jax.block_until_ready(
        relative_factorized_position_pallas(dims, w1, b1, w2, b2))
    ref = reference(dims, w1, b1, w2, b2)
    assert out.shape == (1, math.prod(dims), hidden)
    assert jnp.allclose(out, ref, atol=3e-5, rtol=1e-5), "mismatch for 3-D dims"

    print("KERNEL_OK")
</pallas_src>

<mosaic_0001>
module attributes {stable_mosaic.version = 11 : i64} {
  func.func @_pos_enc_kernel(%arg0: i32, %arg1: i32, %arg2: i32, %arg3: memref<1x512xf32, #tpu.memory_space<vmem>>, %arg4: memref<1x512xf32, #tpu.memory_space<vmem>>, %arg5: memref<8x512xf32, #tpu.memory_space<vmem>>) attributes {dimension_semantics = [#tpu.dimension_semantics<parallel>, #tpu.dimension_semantics<parallel>, #tpu.dimension_semantics<parallel>], iteration_bounds = array<i64: 1, 2, 1>, scalar_prefetch = 0 : i64, scratch_operands = 0 : i64, tpu.core_type = #tpu.core_type<tc>, window_params = [{transform_indices = @transform_0, window_bounds = array<i64: 1, 512>}, {transform_indices = @transform_1, window_bounds = array<i64: 1, 512>}, {transform_indices = @transform_2, window_bounds = array<i64: 8, 512>}]} {
    %c0 = arith.constant 0 : index
    %c0_0 = arith.constant 0 : index
    %0 = vector.load %arg3[%c0, %c0_0] : memref<1x512xf32, #tpu.memory_space<vmem>>, vector<1x512xf32>
    %c0_1 = arith.constant 0 : index
    %c0_2 = arith.constant 0 : index
    %1 = vector.load %arg4[%c0_1, %c0_2] : memref<1x512xf32, #tpu.memory_space<vmem>>, vector<1x512xf32>
    %c8_i32 = arith.constant 8 : i32
    %2 = arith.muli %arg1, %c8_i32 : i32
    %3 = tpu.iota {dimensions = array<i32: 0>} : vector<8x512xi32>
    %4 = arith.sitofp %3 : vector<8x512xi32> to vector<8x512xf32>
    %5 = arith.sitofp %2 : i32 to f32
    %6 = vector.broadcast %5 : f32 to vector<8x512xf32>
    %7 = arith.addf %6, %4 : vector<8x512xf32>
    %8 = vector.broadcast %1 : vector<1x512xf32> to vector<8x512xf32>
    %9 = arith.mulf %7, %8 : vector<8x512xf32>
    %10 = vector.broadcast %0 : vector<1x512xf32> to vector<8x512xf32>
    %11 = arith.addf %9, %10 : vector<8x512xf32>
    %c0_3 = arith.constant 0 : index
    %c0_4 = arith.constant 0 : index
    %12 = vector.load %arg5[%c0_3, %c0_4] : memref<8x512xf32, #tpu.memory_space<vmem>>, vector<8x512xf32>
    tpu.vector_store %arg5[%c0_3, %c0_4], %11 {strides = array<i32>} : memref<8x512xf32, #tpu.memory_space<vmem>>, vector<8x512xf32>,
    return
  }
  func.func @transform_0(%arg0: i32, %arg1: i32, %arg2: i32) -> (i32, i32) {
    %c0_i32 = arith.constant 0 : i32
    %c0_i32_0 = arith.constant 0 : i32
    return %c0_i32, %arg2 : i32, i32
  }
  func.func @transform_1(%arg0: i32, %arg1: i32, %arg2: i32) -> (i32, i32) {
    %c0_i32 = arith.constant 0 : i32
    %c0_i32_0 = arith.constant 0 : i32
    return %c0_i32, %arg2 : i32, i32
  }
  func.func @transform_2(%arg0: i32, %arg1: i32, %arg2: i32) -> (i32, i32) {
    %c2_i32 = arith.constant 2 : i32
    %0 = arith.muli %arg0, %c2_i32 : i32
    %1 = arith.addi %0, %arg1 : i32
    %c0_i32 = arith.constant 0 : i32
    return %1, %arg2 : i32, i32
  }
}

</mosaic_0001>

<bundles_post_ra>
// kernel: tpu_custom_call.1
= control target key start
LH: loop header
LB: loop body
LE: loop exit
PB: predicated region body
PF: predicated region fallthrough
CT: control target
= control target key end

     0   :  { %7 = vsyncpa [#allocation3], 0  ;;  %s806_s0 = inlined_call_operand.hbm [shape: f32[1,512], index: 0, kind: input, shape index: {}]   ;;  %s807_s1 = inlined_call_operand.hbm [shape: f32[1,512], index: 1, kind: input, shape index: {}]   ;;  %s808_s2 = inlined_call_operand.hbm [shape: f32[16,512], index: 2, kind: output, shape index: {}]  }
   0x1   :  { %8 = vsyncpa [#allocation6], 0 }
   0x2   :  { %9 = vsyncpa [#allocation4], 0 }
   0x3   :  { %11 = vsyncpa [#allocation4 + $0x1], 0  ;;  %s619_s9 = smov 0   ;;  %s621_s10 = smov 0  }
   0x4   :  { %s623_s11 = smov 0   ;;  %s625_s12 = smov 0  }
   0x5   :  { %s627_s13 = smov 0   ;;  %s629_s14 = smov 0  }
   0x6 LB: > { %s365_s15 = sadd.s32 4294967295, %s599_s14   ;;  %s366_s16 = sadd.s32 4294967294, %s599_s14   ;;  %s599_s14 = sphi %s629_s14, %s17_s14   ;;  %s595_s13 = sphi %s627_s13, %s826_s13   ;;  %s591_s12 = sphi %s625_s12, %s825_s12   ;;  %s587_s11 = sphi %s623_s11, %s824_s11   ;;  %s583_s10 = sphi %s621_s10, %s823_s10   ;;  %s579_s9 = sphi %s619_s9, %s822_s9  }
   0x7   : > { %s32_s17 = sadd.s32 1, %s595_s13  ;;  %s101_s18 = sadd.s32 1, %s587_s11 }
   0x8   : > { %p34_p0 = scmp.ge.s32.totalorder %s32_s17, 2  ;;  %p111_p1 = scmp.ne.s32.totalorder %s587_s11, %s583_s10 }
   0x9   : > { %p112_p2 = scmp.eq.s32.totalorder %s365_s15, 1  ;;  %p117_p3 = scmp.ne.s32.totalorder %s583_s10, %s579_s9 }
   0xa   : > { %s828_s17 = smov (%p34_p0, %s32_s17), 0  ;;  %p118_p5 = scmp.eq.s32.totalorder %s366_s16, 1 }
   0xb   : > { %p659_p4 = por %p112_p2, %p111_p1  ;;  %s96_s20 = ssub.s32 %s595_s13, %s828_s17 }
   0xc   : > { %p367_p6 = scmp.ge.s32.totalorder %s599_s14, 1  ;;  %p99_p7 = scmp.eq.s32.totalorder %s96_s20, 0 }
   0xd   : > { %s813_s19 = scalar_select %p659_p4, 1, 0 }
   0xe   : > { %p666_p8 = por %p118_p5, %p117_p3  ;;  %p125_p9 = scmp.lt.s32.totalorder %s599_s14, 3 }
   0xf   : > { %s672_s22 = scalar_select %p99_p7, %s587_s11, %s101_s18  }
  0x10   : > { %s814_s21 = scalar_select %p666_p8, 1, 0 }
  0x11   : > { %p674_p10 = pnand %p367_p6, %p125_p9  ;;  %p678_p11 = scmp.eq.s32.totalorder %s365_s15, 0 }
  0x12   : > { %s601_s25 = smov [#allocation2]   ;;  %s602_s27 = smov [#allocation5]  }
  0x13   : > { %s815_s23 = scalar_select %p674_p10, 1, 0 }
  0x14   : > { %s816_s24 = scalar_select %p678_p11, 1, 0 }
  0x15   : > { %p391_p12 = pneg %p674_p10  ;;  %s141_s26 = sshll.u32 %s601_s25, 4  ;;  %s142_s26 = int_to_ptr.vmem [resolvable:$true] %s141_s26 }
  0x16   : > { %s155_s28 = sshll.u32 %s602_s27, 4  ;;  %s457_s4 = scalar_lea.hbm %s806_s0, 64  ;;  %s690_s28 = int_to_ptr.vmem [resolvable:$true] %s155_s28 }
  0x17   : > { %p686_p13 = pnand %p678_p11, %p391_p12  ;;  %p458_p0 = scmp.ne.s32.totalorder %s806_s0, %s457_s4 }
  0x18   : > { %p464_p5 = scmp.lt.u32.totalorder %s457_s4, %s806_s0 }
  0x19   : > { %p459_p1 = pneg %p686_p13 }
  0x1b   : > { %p460_p2 = pnand %p459_p1, %p458_p0 }
  0x1d   : > { %p461_p3 = pneg %p460_p2 }
  0x1f   : > { %p466_p6 = pnand %p464_p5, %p461_p3 }
  0x21   : > { %469 = shalt.err (!%p466_p6)
}
  0x22   : > { %s470_s15 = scalar_lea.vmem %s142_s26, 64  ;;  %p478_p8 = scmp.lt.s32.totalorder %s142_s26, %s142_s26 }
  0x23   : > { %p471_p7 = scmp.ne.s32.totalorder %s142_s26, %s470_s15  ;;  %p479_p4 = scmp.lt.s32.totalorder %s470_s15, %s470_s15 }
  0x25   : > { %p473_p9 = pnand %p471_p7, %p459_p1  ;;  %p480_p11 = por %p479_p4, %p478_p8 }
  0x27   : > { %p474_p12 = pneg %p473_p9 }
  0x29   : > { %p481_p10 = pnand %p480_p11, %p474_p12 }
  0x2b   : > { %484 = shalt.err (!%p481_p10)
}
  0x2c   : > { %394 = dma.hbm_to_vmem [thread:$0]  (!%p686_p13), %s806_s0, 64, %s142_s26, [#allocation3]  }
  0x2d   : > { %s485_s27 = scalar_lea.hbm %s807_s1, 64 }
  0x2e   : > { %p486_p0 = scmp.ne.s32.totalorder %s807_s1, %s485_s27  ;;  %p492_p10 = scmp.lt.u32.totalorder %s485_s27, %s807_s1 }
  0x30   : > { %p488_p4 = pnand %p486_p0, %p459_p1 }
  0x32   : > { %p489_p8 = pneg %p488_p4 }
  0x34   : > { %p494_p11 = pnand %p492_p10, %p489_p8 }
  0x36   : > { %497 = shalt.err (!%p494_p11)
}
  0x37   : > { %s498_s26 = scalar_lea.vmem %s690_s28, 64  ;;  %p506_p6 = scmp.lt.s32.totalorder %s690_s28, %s690_s28 }
  0x38   : > { %p499_p2 = scmp.ne.s32.totalorder %s690_s28, %s498_s26  ;;  %p507_p7 = scmp.lt.s32.totalorder %s498_s26, %s498_s26 }
  0x3a   : > { %p501_p3 = pnand %p499_p2, %p459_p1  ;;  %p508_p9 = por %p507_p7, %p506_p6 }
  0x3c   : > { %p502_p5 = pneg %p501_p3 }
  0x3e   : > { %p509_p12 = pnand %p508_p9, %p502_p5 }
  0x40   : > { %512 = shalt.err (!%p509_p12)
}
  0x41   : > { %397 = dma.hbm_to_vmem [thread:$0]  (!%p686_p13), %s807_s1, 64, %s690_s28, [#allocation6]  }
  0x42   : > { %p818_p0 = scmp.ne.s32.totalorder %s815_s23, 0 }
  0x43   : > { %p819_p4 = scmp.ne.s32.totalorder (!%p818_p0), %s816_s24, 0 }
  0x44   : > { %168 = sbr.rel (%p818_p0) target bundleno = 106 (0x6a), region = 28 }
  0x4b   : > { %566 = dma.done.wait (%p819_p4), [#allocation3], 64  }
  0x4c   : > { %568 = vsyncadd (%p819_p4), [#allocation3], 4294967232 }
  0x4d   : > { %570 = dma.done.wait (%p819_p4), [#allocation6], 64  }
  0x4e   : > { %572 = vsyncadd (%p819_p4), [#allocation6], 4294967232  ;;  %s374_s29 = sshll.u32 %s591_s12, 3  ;;  %v197_v0 = vlaneseq  ;;  %s186_s28 = sand.u32 1, %s583_s10   ;;  %v194_v9 = vld [vmem:[#allocation2] sm:$0xf] }
  0x4f   : > { %s200_s23 = scvt.s32.f32 %s374_s29  ;;  %s373_s8 = sshll.u32 %s186_s28, 5  ;;  %v195_v10 = vld [vmem:[#allocation5] sm:$0xf] }
  0x50   : > { %v198_v1 = vshrl.u32 %v197_v0, 7  ;;  %s188_s24 = scalar_lea.vmem [#allocation7], %s373_s8  ;;  %s380_s16 = sshll.u32 %s591_s12, 9 }
  0x51   : > { %v201_v2 = vstv %s200_s23  ;;  %s276_s15 = sshll.u32 %s188_s24, 4  ;;  %s759_s25 = scalar_lea.hbm %s808_s2, %s380_s16  ;;  %s754_s15 = int_to_ptr.vmem [resolvable:$true] %s276_s15 }
  0x52   : > { %v199_v3 = vcvt.s32.f32 %v198_v1  ;;  %v206_v4 = vsub.s32 0, %v198_v1  ;;  %v210_v5 = vsub.s32 1, %v198_v1  ;;  %v214_v6 = vsub.s32 2, %v198_v1  ;;  %s258_s12 = scalar_lea.sflag [#allocation4], %s186_s28  ;;  %s513_s27 = scalar_lea.vmem %s754_s15, 512 }
  0x53   : > { %v218_v7 = vsub.s32 3, %v198_v1  ;;  %p514_p13 = scmp.ne.s32.totalorder %s754_s15, %s513_s27  ;;  %p820_p1 = scmp.ne.s32.totalorder %s813_s19, 0 }
  0x54   : > { %v202_v8 = vadd.f32 %v201_v2, %v199_v3  ;;  %v207_v11 = vrot.slane %v195_v10, %v206_v4  ;;  %v232_v12 = vrot.slane %v194_v9, %v206_v4  ;;  %v211_v13 = vrot.slane %v195_v10, %v210_v5  ;;  %s603_s30 = smov [#allocation7]  }
  0x55   : > { %v236_v14 = vrot.slane %v194_v9, %v210_v5  ;;  %v215_v15 = vrot.slane %v195_v10, %v214_v6  ;;  %v240_v16 = vrot.slane %v194_v9, %v214_v6  ;;  %v219_v17 = vrot.slane %v195_v10, %v218_v7  ;;  %p515_p8 = pnand %p514_p13, %p820_p1  ;;  %s517_s3 = sshll.u32 %s603_s30, 4  ;;  %s518_s3 = int_to_ptr.vmem [resolvable:$false] %s517_s3 }
  0x56   : > { %v244_v18 = vrot.slane %v194_v9, %v218_v7  ;;  %v224_v19 = vmul.f32 %v207_v11, %v202_v8  ;;  %v225_v20 = vmul.f32 %v211_v13, %v202_v8  ;;  %s519_s4 = scalar_lea.vmem %s518_s3, 1024  ;;  %p520_p11 = scmp.lt.s32.totalorder %s754_s15, %s518_s3 }
  0x57   : > { %v226_v21 = vmul.f32 %v215_v15, %v202_v8  ;;  %v227_v22 = vmul.f32 %v219_v17, %v202_v8  ;;  %p516_p10 = pneg %p515_p8  ;;  %p521_p2 = scmp.lt.s32.totalorder %s519_s4, %s513_s27 }
  0x58   : > { %v249_v23 = vadd.f32 %v232_v12, %v224_v19  ;;  %v250_v24 = vadd.f32 %v236_v14, %v225_v20 }
  0x59   : > { %v251_v25 = vadd.f32 %v240_v16, %v226_v21  ;;  %v252_v26 = vadd.f32 %v244_v18, %v227_v22  ;;  %p522_p3 = por %p521_p2, %p520_p11 }
  0x5a   : > { %253 = vst [vmem:[%s188_s24] sm:$0xff] %v249_v23  ;;  %254 = vst [vmem:[%s188_s24 + $0x8] sm:$0xff] %v250_v24 }
  0x5b   : > { %255 = vst [vmem:[%s188_s24 + $0x10] sm:$0xff] %v251_v25  ;;  %256 = vst [vmem:[%s188_s24 + $0x18] sm:$0xff] %v252_v26  ;;  %p523_p5 = pnand %p522_p3, %p516_p10 }
  0x5d   : > { %526 = shalt.err (!%p523_p5)
}
  0x5e   : > { %s527_s5 = scalar_lea.hbm %s759_s25, 512  ;;  %s531_s7 = scalar_lea.hbm %s808_s2, 1024 }
  0x5f   : > { %p528_p6 = scmp.ne.s32.totalorder %s759_s25, %s527_s5  ;;  %p532_p12 = scmp.lt.u32.totalorder %s759_s25, %s808_s2 }
  0x60   : > { %p533_p0 = scmp.lt.u32.totalorder %s531_s7, %s527_s5  ;;  %p535_p13 = scmp.lt.u32.totalorder %s527_s5, %s759_s25 }
  0x61   : > { %p529_p7 = pnand %p528_p6, %p820_p1 }
  0x62   : > { %p534_p4 = por %p533_p0, %p532_p12 }
  0x63   : > { %p530_p9 = pneg %p529_p7 }
  0x64   : > { %p536_p8 = por %p535_p13, %p534_p4 }
  0x66   : > { %p537_p10 = pnand %p536_p8, %p530_p9 }
  0x68   : > { %540 = shalt.err (!%p537_p10)
}
  0x69   : > { %389 = dma.vmem_to_hbm [thread:$0]  (%p820_p1), %s754_s15, 512, %s759_s25, %s258_s12  }
  0x6a PF: > { %p406_p11 = scmp.ge.s32.totalorder %s599_s14, 2  ;;  %s288_s23 = sand.u32 1, %s579_s9  }
  0x6b   : > { %p821_p2 = scmp.ne.s32.totalorder %s814_s21, 0  ;;  %s289_s8 = scalar_lea.sflag [#allocation4], %s288_s23 }
  0x6d   : > { %p399_p3 = pnand %p406_p11, %p821_p2 }
  0x6f   : > { %574 = dma.done.wait (!%p399_p3), %s289_s8, 512  }
  0x70   : > { %576 = vsyncadd (!%p399_p3), %s289_s8, 4294966784  ;;  %s17_s14 = sadd.s32 1, %s599_s14   ;;  %s822_s9 = smov %s583_s10 }
  0x71   : > { %p14_p5 = scmp.ge.s32.totalorder %s17_s14, 4   ;;  %s823_s10 = smov %s587_s11 }
  0x72   : > { %s824_s11 = smov %s672_s22  ;;  %s825_s12 = smov %s595_s13 }
  0x73   : > { %s826_s13 = smov %s828_s17  ;;  %16 = sbr.rel (!%p14_p5) target bundleno = 6 (0x6), region = 71 }
  0x7a   :  { %294 = vsyncpa [#allocation3], 1 }
  0x7b   :  { %296 = vsyncpa [#allocation3 + $0x1], 1 }
  0x7c   :  { %297 = vsyncpa [#allocation6], 1 }
  0x7d   :  { %298 = vsyncpa [#allocation4], 1 }
  0x7e   :  { %300 = vsyncpa [#allocation4 + $0x1], 1 }

</bundles_post_ra>
